<compile_context>
chip_gen: v6e
topology: v6e:2x2x1
jax: 0.10.0
libtpu: 0.0.40
codegen_flags: <defaults>
</compile_context>

<pallas_src>
import math

import jax
import jax.numpy as jnp
from jax.experimental import pallas as pl
from jax.experimental.pallas import tpu as pltpu

D_MODEL = 8
D_FF = 16

TILE_N_DEFAULT = 1024  # lane-axis tile (columns of the feature-major view)


def _round_up(x, m):
    return (x + m - 1) // m * m


def _ffn_kernel(x_ref, w1_ref, b1_ref, w2_ref, b2_ref, o_ref):
    # Feature-major tiles:
    #   x_ref : (D_MODEL, tile_n)   w1_ref: (D_FF, D_MODEL)  b1_ref: (D_FF, 1)
    #   w2_ref: (D_MODEL, D_FF)     b2_ref: (D_MODEL, 1)     o_ref : (D_MODEL, tile_n)
    x = x_ref[...]
    h = jnp.dot(w1_ref[...], x, preferred_element_type=jnp.float32) + b1_ref[...]
    h = jnp.maximum(h, 0.0)  # ReLU
    out = jnp.dot(w2_ref[...], h, preferred_element_type=jnp.float32) + b2_ref[...]
    o_ref[...] = out.astype(o_ref.dtype)


def positionwise_feedforward(x, params):
    """x: (..., D_MODEL) f32.  params: PyTorch-convention weights/biases."""
    orig_shape = x.shape
    D = orig_shape[-1]
    assert D == D_MODEL
    x2d = x.reshape(-1, D)                      # (N, D)
    N = x2d.shape[0]

    # Lane-axis tile: at least 128, at most TILE_N_DEFAULT.
    tile_n = min(TILE_N_DEFAULT, _round_up(max(N, 1), 128))
    n_pad = _round_up(max(N, 1), tile_n)
    grid = (n_pad // tile_n,)

    # Pad rows to the tile multiple, then go feature-major: lane axis = rows.
    x_pad = jnp.pad(x2d, ((0, n_pad - N), (0, 0)))
    x_fm = x_pad.T                               # (D_MODEL, n_pad)

    # PyTorch convention already matches feature-major: W1 (d_ff, d_model),
    # W2 (d_model, d_ff).  Biases become broadcastable columns.
    w1 = params["w1"]                            # (D_FF, D_MODEL)
    w2 = params["w2"]                            # (D_MODEL, D_FF)
    b1 = params["b1"].reshape(D_FF, 1)
    b2 = params["b2"].reshape(D_MODEL, 1)

    vmem = pltpu.MemorySpace.VMEM
    flops = 4 * n_pad * D_MODEL * D_FF           # two matmuls, 2*M*K*N each
    bytes_accessed = 4 * (
        D_MODEL * n_pad * 2                      # x in + out
        + D_FF * D_MODEL + D_FF                  # W1, b1
        + D_MODEL * D_FF + D_MODEL               # W2, b2
    )

    out_fm = pl.pallas_call(
        _ffn_kernel,
        out_shape=jax.ShapeDtypeStruct((D_MODEL, n_pad), jnp.float32),
        grid_spec=pltpu.PrefetchScalarGridSpec(
            num_scalar_prefetch=0,
            grid=grid,
            in_specs=[
                pl.BlockSpec((D_MODEL, tile_n), lambda i: (0, i), memory_space=vmem),
                pl.BlockSpec((D_FF, D_MODEL), lambda i: (0, 0), memory_space=vmem),
                pl.BlockSpec((D_FF, 1), lambda i: (0, 0), memory_space=vmem),
                pl.BlockSpec((D_MODEL, D_FF), lambda i: (0, 0), memory_space=vmem),
                pl.BlockSpec((D_MODEL, 1), lambda i: (0, 0), memory_space=vmem),
            ],
            out_specs=pl.BlockSpec((D_MODEL, tile_n), lambda i: (0, i), memory_space=vmem),
        ),
        compiler_params=pltpu.CompilerParams(
            dimension_semantics=("parallel",),   # v7x: split row tiles across 2 TCs
        ),
        cost_estimate=pl.CostEstimate(
            flops=flops, transcendentals=0, bytes_accessed=bytes_accessed
        ),
    )(x_fm, w1, b1, w2, b2)

    out2d = out_fm.T[:N]                         # drop row padding
    return out2d.reshape(orig_shape)


def _reference(x, params):
    """Plain-JAX reference matching the PyTorch forward."""
    h = jnp.maximum(x @ params["w1"].T + params["b1"], 0.0)
    return h @ params["w2"].T + params["b2"]


if __name__ == "__main__":
    B, S = 2, 8
    key = jax.random.PRNGKey(0)
    keys = jax.random.split(key, 5)

    # nn.Linear default init: U(-1/sqrt(in_features), 1/sqrt(in_features))
    bound1 = 1.0 / math.sqrt(D_MODEL)
    bound2 = 1.0 / math.sqrt(D_FF)
    params = {
        "w1": jax.random.uniform(keys[0], (D_FF, D_MODEL), jnp.float32, -bound1, bound1),
        "b1": jax.random.uniform(keys[1], (D_FF,), jnp.float32, -bound1, bound1),
        "w2": jax.random.uniform(keys[2], (D_MODEL, D_FF), jnp.float32, -bound2, bound2),
        "b2": jax.random.uniform(keys[3], (D_MODEL,), jnp.float32, -bound2, bound2),
    }

    x = jax.random.normal(keys[4], (B, S, D_MODEL), jnp.float32)

    out = positionwise_feedforward(x, params)
    out = jax.block_until_ready(out)

    ref = _reference(x, params)
    assert out.shape == (B, S, D_MODEL)
    assert jnp.allclose(out, ref, atol=1e-5, rtol=1e-5), "mismatch vs reference"

    print("KERNEL_OK")
</pallas_src>

<mosaic_0001>
module attributes {stable_mosaic.version = 11 : i64} {
  func.func @_ffn_kernel(%arg0: i32, %arg1: memref<8x128xf32, #tpu.memory_space<vmem>>, %arg2: memref<16x8xf32, #tpu.memory_space<vmem>>, %arg3: memref<16x1xf32, #tpu.memory_space<vmem>>, %arg4: memref<8x16xf32, #tpu.memory_space<vmem>>, %arg5: memref<8x1xf32, #tpu.memory_space<vmem>>, %arg6: memref<8x128xf32, #tpu.memory_space<vmem>>) attributes {dimension_semantics = [#tpu.dimension_semantics<parallel>], iteration_bounds = array<i64: 1>, scalar_prefetch = 0 : i64, scratch_operands = 0 : i64, tpu.core_type = #tpu.core_type<tc>, window_params = [{transform_indices = @transform_0, window_bounds = array<i64: 8, 128>}, {pipeline_mode = #tpu.pipeline_mode<synchronous>, transform_indices = @transform_1, window_bounds = array<i64: 16, 8>}, {pipeline_mode = #tpu.pipeline_mode<synchronous>, transform_indices = @transform_2, window_bounds = array<i64: 16, 1>}, {pipeline_mode = #tpu.pipeline_mode<synchronous>, transform_indices = @transform_3, window_bounds = array<i64: 8, 16>}, {pipeline_mode = #tpu.pipeline_mode<synchronous>, transform_indices = @transform_4, window_bounds = array<i64: 8, 1>}, {transform_indices = @transform_5, window_bounds = array<i64: 8, 128>}]} {
    %c0 = arith.constant 0 : index
    %c0_0 = arith.constant 0 : index
    %0 = vector.load %arg1[%c0, %c0_0] : memref<8x128xf32, #tpu.memory_space<vmem>>, vector<8x128xf32>
    %c0_1 = arith.constant 0 : index
    %c0_2 = arith.constant 0 : index
    %1 = vector.load %arg2[%c0_1, %c0_2] : memref<16x8xf32, #tpu.memory_space<vmem>>, vector<16x8xf32>
    %cst = arith.constant dense<0.000000e+00> : vector<16x128xf32>
    %2 = tpu.matmul %1, %0, %cst {dimension_numbers = #tpu.dot_dimension_numbers<[1], [0], [0], [1], [0, 0, 1, 1], [], []>} : vector<16x8xf32>, vector<8x128xf32>, vector<16x128xf32> -> vector<16x128xf32>
    %c0_3 = arith.constant 0 : index
    %c0_4 = arith.constant 0 : index
    %3 = vector.load %arg3[%c0_3, %c0_4] : memref<16x1xf32, #tpu.memory_space<vmem>>, vector<16x1xf32>
    %4 = vector.broadcast %3 : vector<16x1xf32> to vector<16x128xf32>
    %5 = arith.addf %2, %4 : vector<16x128xf32>
    %cst_5 = arith.constant 0.000000e+00 : f32
    %6 = vector.broadcast %cst_5 : f32 to vector<16x128xf32>
    %7 = arith.maximumf %5, %6 : vector<16x128xf32>
    %c0_6 = arith.constant 0 : index
    %c0_7 = arith.constant 0 : index
    %8 = vector.load %arg4[%c0_6, %c0_7] : memref<8x16xf32, #tpu.memory_space<vmem>>, vector<8x16xf32>
    %cst_8 = arith.constant dense<0.000000e+00> : vector<8x128xf32>
    %9 = tpu.matmul %8, %7, %cst_8 {dimension_numbers = #tpu.dot_dimension_numbers<[1], [0], [0], [1], [0, 0, 1, 1], [], []>} : vector<8x16xf32>, vector<16x128xf32>, vector<8x128xf32> -> vector<8x128xf32>
    %c0_9 = arith.constant 0 : index
    %c0_10 = arith.constant 0 : index
    %10 = vector.load %arg5[%c0_9, %c0_10] : memref<8x1xf32, #tpu.memory_space<vmem>>, vector<8x1xf32>
    %11 = vector.broadcast %10 : vector<8x1xf32> to vector<8x128xf32>
    %12 = arith.addf %9, %11 : vector<8x128xf32>
    %c0_11 = arith.constant 0 : index
    %c0_12 = arith.constant 0 : index
    %13 = vector.load %arg6[%c0_11, %c0_12] : memref<8x128xf32, #tpu.memory_space<vmem>>, vector<8x128xf32>
    tpu.vector_store %arg6[%c0_11, %c0_12], %12 {strides = array<i32>} : memref<8x128xf32, #tpu.memory_space<vmem>>, vector<8x128xf32>,
    return
  }
  func.func @transform_0(%arg0: i32) -> (i32, i32) {
    %c0_i32 = arith.constant 0 : i32
    %c0_i32_0 = arith.constant 0 : i32
    return %c0_i32, %arg0 : i32, i32
  }
  func.func @transform_1(%arg0: i32) -> (i32, i32) {
    %c0_i32 = arith.constant 0 : i32
    %c0_i32_0 = arith.constant 0 : i32
    %c0_i32_1 = arith.constant 0 : i32
    return %c0_i32, %c0_i32_0 : i32, i32
  }
  func.func @transform_2(%arg0: i32) -> (i32, i32) {
    %c0_i32 = arith.constant 0 : i32
    %c0_i32_0 = arith.constant 0 : i32
    %c0_i32_1 = arith.constant 0 : i32
    return %c0_i32, %c0_i32_0 : i32, i32
  }
  func.func @transform_3(%arg0: i32) -> (i32, i32) {
    %c0_i32 = arith.constant 0 : i32
    %c0_i32_0 = arith.constant 0 : i32
    %c0_i32_1 = arith.constant 0 : i32
    return %c0_i32, %c0_i32_0 : i32, i32
  }
  func.func @transform_4(%arg0: i32) -> (i32, i32) {
    %c0_i32 = arith.constant 0 : i32
    %c0_i32_0 = arith.constant 0 : i32
    %c0_i32_1 = arith.constant 0 : i32
    return %c0_i32, %c0_i32_0 : i32, i32
  }
  func.func @transform_5(%arg0: i32) -> (i32, i32) {
    %c0_i32 = arith.constant 0 : i32
    %c0_i32_0 = arith.constant 0 : i32
    return %c0_i32, %arg0 : i32, i32
  }
}

</mosaic_0001>

<bundles_post_ra>
// kernel: tpu_custom_call.1
= control target key start
LH: loop header
LB: loop body
LE: loop exit
PB: predicated region body
PF: predicated region fallthrough
CT: control target
= control target key end

     0   :  { %vm36_vm0 = vcmask 64512   ;;  %s323_s0 = inlined_call_operand.vmem [shape: f32[8,128], index: 0, kind: input, shape index: {}]   ;;  %s324_s1 = inlined_call_operand.vmem [shape: f32[16,8], index: 1, kind: input, shape index: {}]   ;;  %s325_s2 = inlined_call_operand.vmem [shape: f32[16,1], index: 2, kind: input, shape index: {}]   ;;  %s326_s3 = inlined_call_operand.vmem [shape: f32[8,16], index: 3, kind: input, shape index: {}]   ;;  %s327_s4 = inlined_call_operand.vmem [shape: f32[8,1], index: 4, kind: input, shape index: {}]   ;;  %s328_s5 = inlined_call_operand.hbm [shape: f32[8,128], index: 5, kind: output, shape index: {}]  }
   0x1   :  { %v21_v0 = vld [vmem:[%s323_s0] sm:$0xff]  ;;  %v23_v2 = vld [vmem:[%s324_s1 + $0x8] sm:$0xff] }
   0x2   :  { %v22_v1 = vld [vmem:[%s324_s1] sm:$0xff]  ;;  %225 = vmatprep.subr.mxu0 %v21_v0  ;;  %v25_v3 = vld [vmem:[%s325_s2 + $0x8] sm:$0xff] }
   0x3   :  { %227 = vmatprep.mubr.msk.f32.mxu0 %vm36_vm0, %v22_v1 }
   0x4   :  { %10 = vsyncpa [#allocation3], 0  ;;  %226 = vmatpush3.msra.mxu0 %v21_v0  ;;  %v265_v4 = vmov 0   ;;  %v24_v5 = vld [vmem:[%s325_s2] sm:$0xff]  ;;  %v266_v6 = vmov 0.0   ;;  %vm267_vm1 = vmmov 0  }
   0x5   :  { %241 = vset.pattern.permute.xlu0 %v265_v4  ;;  %228 = vmatmul.mubr.msk.f32.vlgmr.msra.gmra.mxu0 %vm36_vm0, %v23_v2  ;;  %v121_v7 = vld [vmem:[%s327_s4] sm:$0xff]  ;;  %vm127_vm2 = vcmask 130048   ;;  %s268_s4 = smov [#allocation2]  }
   0x6   :  { %33 = vperm.xlu0 %241, %v25_v3   ;;  %242 = vset.pattern.permute.xlu1 %v265_v4  ;;  %v120_v16 = vld [vmem:[%s326_s3] sm:$0xff]  ;;  %s208_s29 = sshll.u32 %s268_s4, 4  ;;  %s209_s29 = int_to_ptr.vmem [resolvable:$true] %s208_s29 }
   0x7   :  { %230 = vmatprep.subr.mxu1 %v266_v6  ;;  %234 = vmatprep.mubr.msk.f32.mxu1 %vm267_vm1, %v266_v6  ;;  %s243_s30 = scalar_lea.vmem %s209_s29, 128  ;;  %p248_p1 = scmp.lt.s32.totalorder %s209_s29, %s209_s29 }
   0x8   :  { %124 = vperm.xlu1 %242, %v121_v7   ;;  %p244_p0 = scmp.ne.s32.totalorder %s209_s29, %s243_s30  ;;  %p249_p2 = scmp.lt.s32.totalorder %s243_s30, %s243_s30 }
   0xa   :  { %28 = vperm.xlu0 %241, %v24_v5   ;;  %p250_p3 = por %p249_p2, %p248_p1 }
   0xc   :  { %p251_p4 = pnand %p250_p3, %p244_p0 }
  0x81   :  { %v34_v8 = vpop.permute.xlu0 %33 }
  0x83   :  { %v125_v17 = vpop.permute.xlu1 %124 }
  0x85   :  { %v29_v11 = vpop.permute.xlu0 %28 }
  0xc5   :  { %v229_v9 = vpop.f32.mrf.mxu0 }
  0xc6   :  { %v115_v10 = vadd.f32 %v229_v9, %v34_v8 }
  0xc7   :  { %v109_v12 = vpop.f32.mrf.mxu0 }
  0xc8   :  { %v119_v13 = vmax.f32 %v115_v10, 0.0  ;;  %v110_v14 = vadd.f32 %v109_v12, %v29_v11 }
  0xca   :  { %v118_v15 = vmax.f32 %v110_v14, 0.0  ;;  %231 = vmatpush3.msra.mxu1 %v119_v13 }
  0xcb   :  { %232 = vmatprep.subr.mxu1 %v266_v6 }
  0xcc   :  { %233 = vmatpush3.msra.mxu1 %v118_v15 }
  0xcd   :  { %235 = vmatmul.mubr.msk.f32.vlgmr.msra.gmra.mxu1 %vm127_vm2, %v120_v16 }
 0x18d   :  { %v197_v18 = vpop.f32.mrf.mxu1 }
 0x18e   :  { %v198_v19 = vadd.f32 %v197_v18, %v125_v17 }
 0x18f   :  { %v236_v20 = vpop.f32.mrf.mxu1 }
 0x190   :  { %201 = vst [vmem:[#allocation2] sm:$0xff] %v198_v19 }
 0x191   :  { %254 = shalt.err (!%p251_p4)
}
 0x192   :  { %211 = dma.vmem_to_hbm [thread:$0]  %s209_s29, 128, %s328_s5, [#allocation3]  }
 0x193   :  { %263 = dma.done.wait [#allocation3], 128  }
 0x194   :  { %264 = vsyncadd [#allocation3], 4294967168 }
 0x195   :  { %215 = vsyncpa [#allocation3], 1 }

</bundles_post_ra>
